<compile_context>
chip_gen: v5e
topology: v5e:2x2
jax: 0.10.0
libtpu: 0.0.40
codegen_flags: <defaults>
</compile_context>

<pallas_src>
import functools
import math

import numpy as np
import jax
import jax.numpy as jnp
from jax import lax
from jax.experimental import pallas as pl
from jax.experimental.pallas import tpu as pltpu


def _gates(gi, gh, bhn, h, H):
    # PyTorch GRU cell; gi already contains b_ih + b_hh[r,z], gh has no bias.
    r = jax.nn.sigmoid(gi[:, 0:H] + gh[:, 0:H])
    z = jax.nn.sigmoid(gi[:, H:2 * H] + gh[:, H:2 * H])
    n = jnp.tanh(gi[:, 2 * H:3 * H] + r * (gh[:, 2 * H:3 * H] + bhn))
    return (1.0 - z) * n + z * h


def concat_pool_gru_kernel(
        len_sref,                       # SMEM (B,) int32  (scalar prefetch)
        len_vref,                       # VMEM (B, 1) int32
        xf_ref, xb_ref,                 # VMEM (Tc*B, E) fwd / reversed-order chunk views
        wih_f_ref, whh_f_ref, gbi_f_ref, bhn_f_ref,
        wih_b_ref, whh_b_ref, gbi_b_ref, bhn_b_ref,
        wout_ref, bout_ref,
        out_ref,                        # VMEM (B, Npad) f32
        hf_ref, hb_ref, sf_ref, sb_ref, mf_ref, mb_ref,   # (B, H) f32 carries
        gif_ref, gib_ref,               # (Tc*B, 3H) f32 hoisted projections
        *, Tc, B, H, n_chunks):
    c = pl.program_id(0)
    T_total = n_chunks * Tc

    lengths = len_vref[...]                                       # (B, 1) int32
    # pack_padded_sequence(enforce_sorted=True): lengths[0] == padded output len
    maxlen = jnp.minimum(jnp.maximum(len_sref[0], 1), T_total)    # clamped scalar

    @pl.when(c == 0)
    def _init():
        hf_ref[...] = jnp.zeros(hf_ref.shape, jnp.float32)
        hb_ref[...] = jnp.zeros(hb_ref.shape, jnp.float32)
        sf_ref[...] = jnp.zeros(sf_ref.shape, jnp.float32)
        sb_ref[...] = jnp.zeros(sb_ref.shape, jnp.float32)
        mf_ref[...] = jnp.full(mf_ref.shape, -jnp.inf, jnp.float32)
        mb_ref[...] = jnp.full(mb_ref.shape, -jnp.inf, jnp.float32)

    # ---- hoisted input projections: one big MXU matmul per chunk/direction ----
    gif_ref[...] = (jnp.dot(xf_ref[...], wih_f_ref[...],
                            preferred_element_type=jnp.float32) + gbi_f_ref[...])
    gib_ref[...] = (jnp.dot(xb_ref[...], wih_b_ref[...],
                            preferred_element_type=jnp.float32) + gbi_b_ref[...])

    whh_f = whh_f_ref[...]; bhn_f = bhn_f_ref[...]
    whh_b = whh_b_ref[...]; bhn_b = bhn_b_ref[...]
    cdt = whh_f.dtype

    t0_f = c * Tc                        # global start time of the fwd chunk
    cc = (n_chunks - 1) - c              # bwd consumes chunks in reverse order
    t0_b = cc * Tc
    vf = jnp.clip(maxlen - t0_f, 0, Tc)  # valid fwd steps in this chunk
    vb = jnp.clip(maxlen - t0_b, 0, Tc)  # valid bwd steps in this chunk
    nsteps = jnp.maximum(vf, vb)         # dynamic trip count (skips padded tail)

    maxlen_v = jnp.full((B, 1), maxlen, jnp.int32)
    vb_v = jnp.full((B, 1), vb, jnp.int32)

    def body(j, carry):
        h_f, h_b, s_f, s_b, m_f, m_b = carry

        # -------- forward direction (time ascending) --------
        gi_f = gif_ref[pl.ds(pl.multiple_of(j * B, B), B), :]
        gh_f = jnp.dot(h_f.astype(cdt), whh_f, preferred_element_type=jnp.float32)
        h_new_f = _gates(gi_f, gh_f, bhn_f, h_f, H)
        t_f = t0_f + j
        valid_f = t_f < lengths                        # (B, 1)
        out_f = jnp.where(valid_f, h_new_f, 0.0)       # zero-pad like pad_packed_sequence
        s_f = s_f + out_f
        m_f = jnp.where(t_f < maxlen_v, jnp.maximum(m_f, out_f), m_f)
        h_f = jnp.where(valid_f, h_new_f, h_f)

        # -------- backward direction (time descending), interleaved --------
        tl_b = jnp.maximum(vb - 1 - j, 0)              # local step inside bwd chunk
        gi_b = gib_ref[pl.ds(pl.multiple_of(tl_b * B, B), B), :]
        gh_b = jnp.dot(h_b.astype(cdt), whh_b, preferred_element_type=jnp.float32)
        h_new_b = _gates(gi_b, gh_b, bhn_b, h_b, H)
        t_b = t0_b + tl_b
        valid_b = t_b < lengths                        # (B, 1)
        live_b = j < vb_v                              # (B, 1): this bwd step exists
        upd_b = jnp.where(valid_b, h_new_b, 0.0)       # stays 0 until t == length-1
        h_b = jnp.where(live_b, upd_b, h_b)
        s_b = s_b + jnp.where(live_b, upd_b, 0.0)
        m_b = jnp.where(live_b, jnp.maximum(m_b, upd_b), m_b)

        return h_f, h_b, s_f, s_b, m_f, m_b

    carry0 = (hf_ref[...], hb_ref[...], sf_ref[...], sb_ref[...],
              mf_ref[...], mb_ref[...])
    h_f, h_b, s_f, s_b, m_f, m_b = lax.fori_loop(0, nsteps, body, carry0)

    hf_ref[...] = h_f; hb_ref[...] = h_b
    sf_ref[...] = s_f; sb_ref[...] = s_b
    mf_ref[...] = m_f; mb_ref[...] = m_b

    # ---- concat pooling + fused Linear + log_softmax (last chunk only) ----
    @pl.when(c == n_chunks - 1)
    def _finalize():
        inv_len = 1.0 / maxlen.astype(jnp.float32)
        feat = jnp.concatenate([s_f * inv_len, s_b * inv_len, m_f, m_b], axis=1)  # (B, 4H)
        logits = jnp.dot(feat.astype(cdt), wout_ref[...],
                         preferred_element_type=jnp.float32) + bout_ref[...]       # (B, Npad)
        mx = jnp.max(logits, axis=-1, keepdims=True)
        shifted = logits - mx
        lse = jnp.log(jnp.sum(jnp.exp(shifted), axis=-1, keepdims=True))
        out_ref[...] = shifted - lse


def _round_up(x, m):
    return ((x + m - 1) // m) * m


def concat_pooling_gru_adaptive(seq, lengths, params, n_hidden, n_out, *,
                                time_chunk=128, compute_dtype=jnp.float32):
    """seq: (T, B) int32 token ids; lengths: (B,) int32 sorted descending."""
    T, B = seq.shape
    H = n_hidden
    E = params['emb'].shape[1]
    f32 = jnp.float32

    B_pad = _round_up(max(B, 8), 8)            # sublane multiple
    N_pad = _round_up(max(n_out, 128), 128)    # lane-dense output slab
    Tc = min(time_chunk, T)
    T_pad = _round_up(T, Tc)
    n_chunks = T_pad // Tc

    # ---- glue: pad + embedding gather (stays in plain JAX) ----
    # TODO(synk): the token-id gather stays in XLA; an in-kernel DMA gather (or a
    # pre-projected (VOCAB, 6H) table) would avoid the (T, B, E) HBM round trip.
    seq_p = jnp.zeros((T_pad, B_pad), jnp.int32).at[:T, :B].set(seq.astype(jnp.int32))
    len_p = jnp.zeros((B_pad,), jnp.int32).at[:B].set(lengths.astype(jnp.int32))
    embs2d = jnp.take(params['emb'], seq_p, axis=0).astype(compute_dtype)
    embs2d = embs2d.reshape(T_pad * B_pad, E)          # row t*B_pad + b

    def prep_dir(wih, whh, bih, bhh):
        # fold b_ih + the r/z part of b_hh into the hoisted projection bias
        gbi = bih.astype(f32) + jnp.concatenate(
            [bhh[:, :2 * H].astype(f32), jnp.zeros((1, H), f32)], axis=1)
        bhn = bhh[:, 2 * H:3 * H].astype(f32)
        return wih.astype(compute_dtype), whh.astype(compute_dtype), gbi, bhn

    wih_f, whh_f, gbi_f, bhn_f = prep_dir(params['wih_f'], params['whh_f'],
                                          params['bih_f'], params['bhh_f'])
    wih_b, whh_b, gbi_b, bhn_b = prep_dir(params['wih_b'], params['whh_b'],
                                          params['bih_b'], params['bhh_b'])

    wout_p = jnp.zeros((4 * H, N_pad), compute_dtype).at[:, :n_out].set(
        params['wout'].astype(compute_dtype))
    bout_p = jnp.full((1, N_pad), -1e9, f32).at[:, :n_out].set(params['bout'].astype(f32))

    kernel = functools.partial(concat_pool_gru_kernel,
                               Tc=Tc, B=B_pad, H=H, n_chunks=n_chunks)

    def const(shape):
        n = len(shape)
        return pl.BlockSpec(shape, lambda c, L, _n=n: (0,) * _n)

    grid_spec = pltpu.PrefetchScalarGridSpec(
        num_scalar_prefetch=1,
        grid=(n_chunks,),
        in_specs=[
            const((B_pad, 1)),                                               # lengths (VMEM)
            pl.BlockSpec((Tc * B_pad, E), lambda c, L: (c, 0)),              # embs, fwd chunks
            pl.BlockSpec((Tc * B_pad, E),
                         lambda c, L, _n=n_chunks: (_n - 1 - c, 0)),         # embs, bwd chunks
            const((E, 3 * H)), const((H, 3 * H)), const((1, 3 * H)), const((1, H)),
            const((E, 3 * H)), const((H, 3 * H)), const((1, 3 * H)), const((1, H)),
            const((4 * H, N_pad)), const((1, N_pad)),
        ],
        out_specs=const((B_pad, N_pad)),
        scratch_shapes=([pltpu.VMEM((B_pad, H), jnp.float32) for _ in range(6)]
                        + [pltpu.VMEM((Tc * B_pad, 3 * H), jnp.float32) for _ in range(2)]),
    )

    esize = jnp.dtype(compute_dtype).itemsize
    vmem_est = (2 * 2 * Tc * B_pad * E * esize               # double-buffered fwd+bwd chunks
                + 2 * Tc * B_pad * 3 * H * 4                  # gi scratch
                + 6 * B_pad * H * 4                           # carries
                + (2 * (E + H) * 3 * H + 4 * H * N_pad) * esize
                + 2 * B_pad * N_pad * 4)
    vmem_limit = int(min(96 * 2 ** 20, max(2 * vmem_est, 32 * 2 ** 20)))

    out = pl.pallas_call(
        kernel,
        out_shape=jax.ShapeDtypeStruct((B_pad, N_pad), jnp.float32),
        grid_spec=grid_spec,
        compiler_params=pltpu.CompilerParams(
            dimension_semantics=("arbitrary",),               # carried recurrence over chunks
            vmem_limit_bytes=vmem_limit),
    )(len_p, len_p.reshape(B_pad, 1), embs2d, embs2d,
      wih_f, whh_f, gbi_f, bhn_f,
      wih_b, whh_b, gbi_b, bhn_b,
      wout_p, bout_p)

    return out[:B, :n_out]


def reference_forward(seq, lengths, params, H):
    """Pure-JAX reference reproducing the PyTorch forward semantics."""
    P = jax.lax.Precision.HIGHEST
    T, B = seq.shape
    embs = jnp.take(params['emb'], seq, axis=0).astype(jnp.float32)
    lengths = lengths.astype(jnp.int32)
    max_len = int(lengths[0])  # sorted descending (pack_padded_sequence enforce_sorted)

    def step(x, h, wih, whh, bih, bhh):
        gi = jnp.dot(x, wih, precision=P) + bih
        gh = jnp.dot(h, whh, precision=P) + bhh
        r = jax.nn.sigmoid(gi[:, :H] + gh[:, :H])
        z = jax.nn.sigmoid(gi[:, H:2 * H] + gh[:, H:2 * H])
        n = jnp.tanh(gi[:, 2 * H:] + r * gh[:, 2 * H:])
        return (1.0 - z) * n + z * h

    mask = jnp.arange(T)[:, None] < lengths[None, :]    # (T, B)
    h = jnp.zeros((B, H), jnp.float32)
    outs_f = []
    for t in range(T):
        h_new = step(embs[t], h, params['wih_f'], params['whh_f'],
                     params['bih_f'], params['bhh_f'])
        m = mask[t][:, None]
        outs_f.append(jnp.where(m, h_new, 0.0))
        h = jnp.where(m, h_new, h)

    h = jnp.zeros((B, H), jnp.float32)
    outs_b = [None] * T
    for t in range(T - 1, -1, -1):
        h_new = step(embs[t], h, params['wih_b'], params['whh_b'],
                     params['bih_b'], params['bhh_b'])
        m = mask[t][:, None]
        h = jnp.where(m, h_new, 0.0)
        outs_b[t] = h

    gru_out = jnp.stack(
        [jnp.concatenate([outs_f[t], outs_b[t]], axis=1) for t in range(T)], axis=0)
    gru_out = gru_out[:max_len]                         # pad_packed_sequence output length
    avg = jnp.mean(gru_out, axis=0)                     # adaptive_avg_pool1d(.., 1)
    mxp = jnp.max(gru_out, axis=0)                      # adaptive_max_pool1d(.., 1)
    feat = jnp.concatenate([avg, mxp], axis=1)
    logits = jnp.dot(feat, params['wout'], precision=P) + params['bout']
    return jax.nn.log_softmax(logits, axis=-1)


if __name__ == "__main__":
    VOCAB, EMB, HID, NOUT = 50, 16, 32, 5
    T, B = 8, 4

    key = jax.random.PRNGKey(0)
    ks = jax.random.split(key, 14)
    scale = 1.0 / math.sqrt(HID)

    def u(k, shape):
        return jax.random.uniform(k, shape, jnp.float32, -scale, scale)

    # deterministic synthetic parameters (shapes follow nn.Embedding / nn.GRU / nn.Linear)
    params = dict(
        emb=jax.random.normal(ks[0], (VOCAB, EMB), jnp.float32) * 0.1,   # "pretrained_vec"
        wih_f=u(ks[1], (EMB, 3 * HID)), whh_f=u(ks[2], (HID, 3 * HID)),
        bih_f=u(ks[3], (1, 3 * HID)), bhh_f=u(ks[4], (1, 3 * HID)),
        wih_b=u(ks[5], (EMB, 3 * HID)), whh_b=u(ks[6], (HID, 3 * HID)),
        bih_b=u(ks[7], (1, 3 * HID)), bhh_b=u(ks[8], (1, 3 * HID)),
        wout=u(ks[9], (4 * HID, NOUT)), bout=u(ks[10], (1, NOUT)),
    )

    seq = jax.random.randint(ks[11], (T, B), 0, VOCAB, dtype=jnp.int32)   # (seq_len, batch)
    lengths = jnp.array([7, 6, 5, 3], dtype=jnp.int32)   # sorted descending, maxlen < T

    ref = reference_forward(seq, lengths, params, HID)

    # f32, whole sequence as a single chunk
    out_a = jax.block_until_ready(
        concat_pooling_gru_adaptive(seq, lengths, params, HID, NOUT))
    # f32, streamed over two time chunks (exercises the pipelined / carried path)
    out_b = jax.block_until_ready(
        concat_pooling_gru_adaptive(seq, lengths, params, HID, NOUT, time_chunk=4))
    # bf16 MXU operands with f32 state/accumulators (v6e/v7x recommendation)
    out_c = jax.block_until_ready(
        concat_pooling_gru_adaptive(seq, lengths, params, HID, NOUT,
                                    compute_dtype=jnp.bfloat16))

    for o in (out_a, out_b, out_c):
        assert o.shape == (B, NOUT)
        assert bool(jnp.all(jnp.isfinite(o)))

    np.testing.assert_allclose(np.asarray(out_a), np.asarray(ref), rtol=2e-3, atol=2e-3)
    np.testing.assert_allclose(np.asarray(out_b), np.asarray(ref), rtol=2e-3, atol=2e-3)
    np.testing.assert_allclose(np.asarray(out_c), np.asarray(ref), rtol=5e-2, atol=5e-2)

    print("KERNEL_OK")
</pallas_src>

<mosaic_0001>
module attributes {stable_mosaic.version = 11 : i64} {
  func.func @concat_pool_gru_kernel(%arg0: i32, %arg1: memref<8xi32, #tpu.memory_space<smem>>, %arg2: memref<8x1xi32, #tpu.memory_space<vmem>>, %arg3: memref<64x16xf32, #tpu.memory_space<vmem>>, %arg4: memref<64x16xf32, #tpu.memory_space<vmem>>, %arg5: memref<16x96xf32, #tpu.memory_space<vmem>>, %arg6: memref<32x96xf32, #tpu.memory_space<vmem>>, %arg7: memref<1x96xf32, #tpu.memory_space<vmem>>, %arg8: memref<1x32xf32, #tpu.memory_space<vmem>>, %arg9: memref<16x96xf32, #tpu.memory_space<vmem>>, %arg10: memref<32x96xf32, #tpu.memory_space<vmem>>, %arg11: memref<1x96xf32, #tpu.memory_space<vmem>>, %arg12: memref<1x32xf32, #tpu.memory_space<vmem>>, %arg13: memref<128x128xf32, #tpu.memory_space<vmem>>, %arg14: memref<1x128xf32, #tpu.memory_space<vmem>>, %arg15: memref<8x128xf32, #tpu.memory_space<vmem>>, %arg16: memref<8x32xf32, #tpu.memory_space<vmem>>, %arg17: memref<8x32xf32, #tpu.memory_space<vmem>>, %arg18: memref<8x32xf32, #tpu.memory_space<vmem>>, %arg19: memref<8x32xf32, #tpu.memory_space<vmem>>, %arg20: memref<8x32xf32, #tpu.memory_space<vmem>>, %arg21: memref<8x32xf32, #tpu.memory_space<vmem>>, %arg22: memref<64x96xf32, #tpu.memory_space<vmem>>, %arg23: memref<64x96xf32, #tpu.memory_space<vmem>>) attributes {dimension_semantics = [#tpu.dimension_semantics<arbitrary>], iteration_bounds = array<i64: 1>, scalar_prefetch = 1 : i64, scratch_operands = 8 : i64, tpu.core_type = #tpu.core_type<tc>, window_params = [{pipeline_mode = #tpu.pipeline_mode<synchronous>, transform_indices = @transform_0, window_bounds = array<i64: 8, 1>}, {transform_indices = @transform_1, window_bounds = array<i64: 64, 16>}, {transform_indices = @transform_2, window_bounds = array<i64: 64, 16>}, {pipeline_mode = #tpu.pipeline_mode<synchronous>, transform_indices = @transform_3, window_bounds = array<i64: 16, 96>}, {pipeline_mode = #tpu.pipeline_mode<synchronous>, transform_indices = @transform_4, window_bounds = array<i64: 32, 96>}, {pipeline_mode = #tpu.pipeline_mode<synchronous>, transform_indices = @transform_5, window_bounds = array<i64: 1, 96>}, {pipeline_mode = #tpu.pipeline_mode<synchronous>, transform_indices = @transform_6, window_bounds = array<i64: 1, 32>}, {pipeline_mode = #tpu.pipeline_mode<synchronous>, transform_indices = @transform_7, window_bounds = array<i64: 16, 96>}, {pipeline_mode = #tpu.pipeline_mode<synchronous>, transform_indices = @transform_8, window_bounds = array<i64: 32, 96>}, {pipeline_mode = #tpu.pipeline_mode<synchronous>, transform_indices = @transform_9, window_bounds = array<i64: 1, 96>}, {pipeline_mode = #tpu.pipeline_mode<synchronous>, transform_indices = @transform_10, window_bounds = array<i64: 1, 32>}, {pipeline_mode = #tpu.pipeline_mode<synchronous>, transform_indices = @transform_11, window_bounds = array<i64: 128, 128>}, {pipeline_mode = #tpu.pipeline_mode<synchronous>, transform_indices = @transform_12, window_bounds = array<i64: 1, 128>}, {pipeline_mode = #tpu.pipeline_mode<synchronous>, transform_indices = @transform_13, window_bounds = array<i64: 8, 128>}]} {
    %c0 = arith.constant 0 : index
    %c0_0 = arith.constant 0 : index
    %0 = vector.load %arg2[%c0, %c0_0] : memref<8x1xi32, #tpu.memory_space<vmem>>, vector<8x1xi32>
    %c0_1 = arith.constant 0 : index
    %1 = memref.load %arg1[%c0_1] : memref<8xi32, #tpu.memory_space<smem>>
    %c1_i32 = arith.constant 1 : i32
    %2 = arith.maxsi %1, %c1_i32 : i32
    %c8_i32 = arith.constant 8 : i32
    %3 = arith.minsi %2, %c8_i32 : i32
    %c0_i32 = arith.constant 0 : i32
    %4 = arith.cmpi eq, %arg0, %c0_i32 : i32
    %5 = arith.extui %4 : i1 to i32
    %c0_i32_2 = arith.constant 0 : i32
    %6 = arith.cmpi ne, %5, %c0_i32_2 : i32
    scf.if %6 {
      %cst_63 = arith.constant 0.000000e+00 : f32
      %55 = vector.broadcast %cst_63 : f32 to vector<8x32xf32>
      %c0_64 = arith.constant 0 : index
      %c0_65 = arith.constant 0 : index
      %56 = vector.load %arg16[%c0_64, %c0_65] : memref<8x32xf32, #tpu.memory_space<vmem>>, vector<8x32xf32>
      tpu.vector_store %arg16[%c0_64, %c0_65], %55 {strides = array<i32>} : memref<8x32xf32, #tpu.memory_space<vmem>>, vector<8x32xf32>,
      %cst_66 = arith.constant 0.000000e+00 : f32
      %57 = vector.broadcast %cst_66 : f32 to vector<8x32xf32>
      %c0_67 = arith.constant 0 : index
      %c0_68 = arith.constant 0 : index
      %58 = vector.load %arg17[%c0_67, %c0_68] : memref<8x32xf32, #tpu.memory_space<vmem>>, vector<8x32xf32>
      tpu.vector_store %arg17[%c0_67, %c0_68], %57 {strides = array<i32>} : memref<8x32xf32, #tpu.memory_space<vmem>>, vector<8x32xf32>,
      %cst_69 = arith.constant 0.000000e+00 : f32
      %59 = vector.broadcast %cst_69 : f32 to vector<8x32xf32>
      %c0_70 = arith.constant 0 : index
      %c0_71 = arith.constant 0 : index
      %60 = vector.load %arg18[%c0_70, %c0_71] : memref<8x32xf32, #tpu.memory_space<vmem>>, vector<8x32xf32>
      tpu.vector_store %arg18[%c0_70, %c0_71], %59 {strides = array<i32>} : memref<8x32xf32, #tpu.memory_space<vmem>>, vector<8x32xf32>,
      %cst_72 = arith.constant 0.000000e+00 : f32
      %61 = vector.broadcast %cst_72 : f32 to vector<8x32xf32>
      %c0_73 = arith.constant 0 : index
      %c0_74 = arith.constant 0 : index
      %62 = vector.load %arg19[%c0_73, %c0_74] : memref<8x32xf32, #tpu.memory_space<vmem>>, vector<8x32xf32>
      tpu.vector_store %arg19[%c0_73, %c0_74], %61 {strides = array<i32>} : memref<8x32xf32, #tpu.memory_space<vmem>>, vector<8x32xf32>,
      %cst_75 = arith.constant 0xFF800000 : f32
      %63 = vector.broadcast %cst_75 : f32 to vector<8x32xf32>
      %c0_76 = arith.constant 0 : index
      %c0_77 = arith.constant 0 : index
      %64 = vector.load %arg20[%c0_76, %c0_77] : memref<8x32xf32, #tpu.memory_space<vmem>>, vector<8x32xf32>
      tpu.vector_store %arg20[%c0_76, %c0_77], %63 {strides = array<i32>} : memref<8x32xf32, #tpu.memory_space<vmem>>, vector<8x32xf32>,
      %cst_78 = arith.constant 0xFF800000 : f32
      %65 = vector.broadcast %cst_78 : f32 to vector<8x32xf32>
      %c0_79 = arith.constant 0 : index
      %c0_80 = arith.constant 0 : index
      %66 = vector.load %arg21[%c0_79, %c0_80] : memref<8x32xf32, #tpu.memory_space<vmem>>, vector<8x32xf32>
      tpu.vector_store %arg21[%c0_79, %c0_80], %65 {strides = array<i32>} : memref<8x32xf32, #tpu.memory_space<vmem>>, vector<8x32xf32>,
    } else {
    }
    %c0_3 = arith.constant 0 : index
    %c0_4 = arith.constant 0 : index
    %7 = vector.load %arg3[%c0_3, %c0_4] : memref<64x16xf32, #tpu.memory_space<vmem>>, vector<64x16xf32>
    %c0_5 = arith.constant 0 : index
    %c0_6 = arith.constant 0 : index
    %8 = vector.load %arg5[%c0_5, %c0_6] : memref<16x96xf32, #tpu.memory_space<vmem>>, vector<16x96xf32>
    %cst = arith.constant dense<0.000000e+00> : vector<64x96xf32>
    %9 = tpu.matmul %7, %8, %cst {dimension_numbers = #tpu.dot_dimension_numbers<[1], [0], [0], [1], [0, 0, 1, 1], [], []>} : vector<64x16xf32>, vector<16x96xf32>, vector<64x96xf32> -> vector<64x96xf32>
    %c0_7 = arith.constant 0 : index
    %c0_8 = arith.constant 0 : index
    %10 = vector.load %arg7[%c0_7, %c0_8] : memref<1x96xf32, #tpu.memory_space<vmem>>, vector<1x96xf32>
    %11 = vector.broadcast %10 : vector<1x96xf32> to vector<64x96xf32>
    %12 = arith.addf %9, %11 : vector<64x96xf32>
    %c0_9 = arith.constant 0 : index
    %c0_10 = arith.constant 0 : index
    %13 = vector.load %arg22[%c0_9, %c0_10] : memref<64x96xf32, #tpu.memory_space<vmem>>, vector<64x96xf32>
    tpu.vector_store %arg22[%c0_9, %c0_10], %12 {strides = array<i32>} : memref<64x96xf32, #tpu.memory_space<vmem>>, vector<64x96xf32>,
    %c0_11 = arith.constant 0 : index
    %c0_12 = arith.constant 0 : index
    %14 = vector.load %arg4[%c0_11, %c0_12] : memref<64x16xf32, #tpu.memory_space<vmem>>, vector<64x16xf32>
    %c0_13 = arith.constant 0 : index
    %c0_14 = arith.constant 0 : index
    %15 = vector.load %arg9[%c0_13, %c0_14] : memref<16x96xf32, #tpu.memory_space<vmem>>, vector<16x96xf32>
    %cst_15 = arith.constant dense<0.000000e+00> : vector<64x96xf32>
    %16 = tpu.matmul %14, %15, %cst_15 {dimension_numbers = #tpu.dot_dimension_numbers<[1], [0], [0], [1], [0, 0, 1, 1], [], []>} : vector<64x16xf32>, vector<16x96xf32>, vector<64x96xf32> -> vector<64x96xf32>
    %c0_16 = arith.constant 0 : index
    %c0_17 = arith.constant 0 : index
    %17 = vector.load %arg11[%c0_16, %c0_17] : memref<1x96xf32, #tpu.memory_space<vmem>>, vector<1x96xf32>
    %18 = vector.broadcast %17 : vector<1x96xf32> to vector<64x96xf32>
    %19 = arith.addf %16, %18 : vector<64x96xf32>
    %c0_18 = arith.constant 0 : index
    %c0_19 = arith.constant 0 : index
    %20 = vector.load %arg23[%c0_18, %c0_19] : memref<64x96xf32, #tpu.memory_space<vmem>>, vector<64x96xf32>
    tpu.vector_store %arg23[%c0_18, %c0_19], %19 {strides = array<i32>} : memref<64x96xf32, #tpu.memory_space<vmem>>, vector<64x96xf32>,
    %c0_20 = arith.constant 0 : index
    %c0_21 = arith.constant 0 : index
    %21 = vector.load %arg6[%c0_20, %c0_21] : memref<32x96xf32, #tpu.memory_space<vmem>>, vector<32x96xf32>
    %c0_22 = arith.constant 0 : index
    %c0_23 = arith.constant 0 : index
    %22 = vector.load %arg8[%c0_22, %c0_23] : memref<1x32xf32, #tpu.memory_space<vmem>>, vector<1x32xf32>
    %c0_24 = arith.constant 0 : index
    %c0_25 = arith.constant 0 : index
    %23 = vector.load %arg10[%c0_24, %c0_25] : memref<32x96xf32, #tpu.memory_space<vmem>>, vector<32x96xf32>
    %c0_26 = arith.constant 0 : index
    %c0_27 = arith.constant 0 : index
    %24 = vector.load %arg12[%c0_26, %c0_27] : memref<1x32xf32, #tpu.memory_space<vmem>>, vector<1x32xf32>
    %c8_i32_28 = arith.constant 8 : i32
    %25 = arith.muli %arg0, %c8_i32_28 : i32
    %c0_i32_29 = arith.constant 0 : i32
    %26 = arith.subi %c0_i32_29, %arg0 : i32
    %c8_i32_30 = arith.constant 8 : i32
    %27 = arith.muli %26, %c8_i32_30 : i32
    %28 = arith.subi %3, %25 : i32
    %c0_i32_31 = arith.constant 0 : i32
    %c8_i32_32 = arith.constant 8 : i32
    %29 = arith.maxsi %c0_i32_31, %28 : i32
    %30 = arith.minsi %c8_i32_32, %29 : i32
    %31 = arith.subi %3, %27 : i32
    %c0_i32_33 = arith.constant 0 : i32
    %c8_i32_34 = arith.constant 8 : i32
    %32 = arith.maxsi %c0_i32_33, %31 : i32
    %33 = arith.minsi %c8_i32_34, %32 : i32
    %34 = arith.maxsi %30, %33 : i32
    %35 = vector.broadcast %3 : i32 to vector<8x1xi32>
    %36 = vector.broadcast %33 : i32 to vector<8x1xi32>
    %c0_35 = arith.constant 0 : index
    %c0_36 = arith.constant 0 : index
    %37 = vector.load %arg16[%c0_35, %c0_36] : memref<8x32xf32, #tpu.memory_space<vmem>>, vector<8x32xf32>
    %c0_37 = arith.constant 0 : index
    %c0_38 = arith.constant 0 : index
    %38 = vector.load %arg17[%c0_37, %c0_38] : memref<8x32xf32, #tpu.memory_space<vmem>>, vector<8x32xf32>
    %c0_39 = arith.constant 0 : index
    %c0_40 = arith.constant 0 : index
    %39 = vector.load %arg18[%c0_39, %c0_40] : memref<8x32xf32, #tpu.memory_space<vmem>>, vector<8x32xf32>
    %c0_41 = arith.constant 0 : index
    %c0_42 = arith.constant 0 : index
    %40 = vector.load %arg19[%c0_41, %c0_42] : memref<8x32xf32, #tpu.memory_space<vmem>>, vector<8x32xf32>
    %c0_43 = arith.constant 0 : index
    %c0_44 = arith.constant 0 : index
    %41 = vector.load %arg20[%c0_43, %c0_44] : memref<8x32xf32, #tpu.memory_space<vmem>>, vector<8x32xf32>
    %c0_45 = arith.constant 0 : index
    %c0_46 = arith.constant 0 : index
    %42 = vector.load %arg21[%c0_45, %c0_46] : memref<8x32xf32, #tpu.memory_space<vmem>>, vector<8x32xf32>
    %c0_i32_47 = arith.constant 0 : i32
    %43 = arith.subi %34, %c0_i32_47 : i32
    %44 = arith.addi %c0_i32_47, %43 : i32
    %c1_i32_48 = arith.constant 1 : i32
    %45:6 = scf.for %arg24 = %c0_i32_47 to %44 step %c1_i32_48 iter_args(%arg25 = %37, %arg26 = %38, %arg27 = %39, %arg28 = %40, %arg29 = %41, %arg30 = %42) -> (vector<8x32xf32>, vector<8x32xf32>, vector<8x32xf32>, vector<8x32xf32>, vector<8x32xf32>, vector<8x32xf32>)  : i32 {
      %c8_i32_63 = arith.constant 8 : i32
      %55 = arith.muli %arg24, %c8_i32_63 : i32
      %56 = tpu.assume_multiple %55, 8 : i32
      %57 = arith.index_cast %56 : i32 to index
      %c0_64 = arith.constant 0 : index
      %58 = vector.load %arg22[%57, %c0_64] : memref<64x96xf32, #tpu.memory_space<vmem>>, vector<8x96xf32>
      %cst_65 = arith.constant dense<0.000000e+00> : vector<8x96xf32>
      %59 = tpu.matmul %arg25, %21, %cst_65 {dimension_numbers = #tpu.dot_dimension_numbers<[1], [0], [0], [1], [0, 0, 1, 1], [], []>} : vector<8x32xf32>, vector<32x96xf32>, vector<8x96xf32> -> vector<8x96xf32>
      %60 = vector.extract_strided_slice %58 {offsets = [0, 0], sizes = [8, 32], strides = [1, 1]} : vector<8x96xf32> to vector<8x32xf32>
      %61 = vector.extract_strided_slice %59 {offsets = [0, 0], sizes = [8, 32], strides = [1, 1]} : vector<8x96xf32> to vector<8x32xf32>
      %62 = arith.addf %60, %61 : vector<8x32xf32>
      %63 = arith.negf %62 : vector<8x32xf32>
      %64 = math.exp %63 : vector<8x32xf32>
      %cst_66 = arith.constant 1.000000e+00 : f32
      %65 = vector.broadcast %cst_66 : f32 to vector<8x32xf32>
      %66 = arith.addf %65, %64 : vector<8x32xf32>
      %67 = arith.divf %65, %66 : vector<8x32xf32>
      %68 = vector.extract_strided_slice %58 {offsets = [0, 32], sizes = [8, 32], strides = [1, 1]} : vector<8x96xf32> to vector<8x32xf32>
      %69 = vector.extract_strided_slice %59 {offsets = [0, 32], sizes = [8, 32], strides = [1, 1]} : vector<8x96xf32> to vector<8x32xf32>
      %70 = arith.addf %68, %69 : vector<8x32xf32>
      %71 = arith.negf %70 : vector<8x32xf32>
      %72 = math.exp %71 : vector<8x32xf32>
      %cst_67 = arith.constant 1.000000e+00 : f32
      %73 = vector.broadcast %cst_67 : f32 to vector<8x32xf32>
      %74 = arith.addf %73, %72 : vector<8x32xf32>
      %75 = arith.divf %73, %74 : vector<8x32xf32>
      %76 = vector.extract_strided_slice %58 {offsets = [0, 64], sizes = [8, 32], strides = [1, 1]} : vector<8x96xf32> to vector<8x32xf32>
      %77 = vector.extract_strided_slice %59 {offsets = [0, 64], sizes = [8, 32], strides = [1, 1]} : vector<8x96xf32> to vector<8x32xf32>
      %78 = vector.broadcast %22 : vector<1x32xf32> to vector<8x32xf32>
      %79 = arith.addf %77, %78 : vector<8x32xf32>
      %80 = arith.mulf %67, %79 : vector<8x32xf32>
      %81 = arith.addf %76, %80 : vector<8x32xf32>
      %82 = math.tanh %81 : vector<8x32xf32>
      %cst_68 = arith.constant 1.000000e+00 : f32
      %83 = vector.broadcast %cst_68 : f32 to vector<8x32xf32>
      %84 = arith.subf %83, %75 : vector<8x32xf32>
      %85 = arith.mulf %84, %82 : vector<8x32xf32>
      %86 = arith.mulf %75, %arg25 : vector<8x32xf32>
      %87 = arith.addf %85, %86 : vector<8x32xf32>
      %88 = arith.addi %25, %arg24 : i32
      %89 = vector.broadcast %88 : i32 to vector<8x1xi32>
      %90 = arith.cmpi slt, %89, %0 : vector<8x1xi32>
      %cst_69 = arith.constant 0.000000e+00 : f32
      %91 = vector.shape_cast %90 : vector<8x1xi1> to vector<8x1xi1>
      %92 = vector.broadcast %91 : vector<8x1xi1> to vector<8x32xi1>
      %93 = vector.broadcast %cst_69 : f32 to vector<8x32xf32>
      %94 = arith.select %92, %87, %93 : vector<8x32xi1>, vector<8x32xf32>
      %95 = arith.addf %arg27, %94 : vector<8x32xf32>
      %96 = vector.broadcast %88 : i32 to vector<8x1xi32>
      %97 = arith.cmpi slt, %96, %35 : vector<8x1xi32>
      %98 = arith.maximumf %arg29, %94 : vector<8x32xf32>
      %99 = vector.shape_cast %97 : vector<8x1xi1> to vector<8x1xi1>
      %100 = vector.broadcast %99 : vector<8x1xi1> to vector<8x32xi1>
      %101 = arith.select %100, %98, %arg29 : vector<8x32xi1>, vector<8x32xf32>
      %102 = vector.shape_cast %90 : vector<8x1xi1> to vector<8x1xi1>
      %103 = vector.broadcast %102 : vector<8x1xi1> to vector<8x32xi1>
      %104 = arith.select %103, %87, %arg25 : vector<8x32xi1>, vector<8x32xf32>
      %c1_i32_70 = arith.constant 1 : i32
      %105 = arith.subi %33, %c1_i32_70 : i32
      %106 = arith.subi %105, %arg24 : i32
      %c0_i32_71 = arith.constant 0 : i32
      %107 = arith.maxsi %106, %c0_i32_71 : i32
      %c8_i32_72 = arith.constant 8 : i32
      %108 = arith.muli %107, %c8_i32_72 : i32
      %109 = tpu.assume_multiple %108, 8 : i32
      %110 = arith.index_cast %109 : i32 to index
      %c0_73 = arith.constant 0 : index
      %111 = vector.load %arg23[%110, %c0_73] : memref<64x96xf32, #tpu.memory_space<vmem>>, vector<8x96xf32>
      %cst_74 = arith.constant dense<0.000000e+00> : vector<8x96xf32>
      %112 = tpu.matmul %arg26, %23, %cst_74 {dimension_numbers = #tpu.dot_dimension_numbers<[1], [0], [0], [1], [0, 0, 1, 1], [], []>} : vector<8x32xf32>, vector<32x96xf32>, vector<8x96xf32> -> vector<8x96xf32>
      %113 = vector.extract_strided_slice %111 {offsets = [0, 0], sizes = [8, 32], strides = [1, 1]} : vector<8x96xf32> to vector<8x32xf32>
      %114 = vector.extract_strided_slice %112 {offsets = [0, 0], sizes = [8, 32], strides = [1, 1]} : vector<8x96xf32> to vector<8x32xf32>
      %115 = arith.addf %113, %114 : vector<8x32xf32>
      %116 = arith.negf %115 : vector<8x32xf32>
      %117 = math.exp %116 : vector<8x32xf32>
      %cst_75 = arith.constant 1.000000e+00 : f32
      %118 = vector.broadcast %cst_75 : f32 to vector<8x32xf32>
      %119 = arith.addf %118, %117 : vector<8x32xf32>
      %120 = arith.divf %118, %119 : vector<8x32xf32>
      %121 = vector.extract_strided_slice %111 {offsets = [0, 32], sizes = [8, 32], strides = [1, 1]} : vector<8x96xf32> to vector<8x32xf32>
      %122 = vector.extract_strided_slice %112 {offsets = [0, 32], sizes = [8, 32], strides = [1, 1]} : vector<8x96xf32> to vector<8x32xf32>
      %123 = arith.addf %121, %122 : vector<8x32xf32>
      %124 = arith.negf %123 : vector<8x32xf32>
      %125 = math.exp %124 : vector<8x32xf32>
      %cst_76 = arith.constant 1.000000e+00 : f32
      %126 = vector.broadcast %cst_76 : f32 to vector<8x32xf32>
      %127 = arith.addf %126, %125 : vector<8x32xf32>
      %128 = arith.divf %126, %127 : vector<8x32xf32>
      %129 = vector.extract_strided_slice %111 {offsets = [0, 64], sizes = [8, 32], strides = [1, 1]} : vector<8x96xf32> to vector<8x32xf32>
      %130 = vector.extract_strided_slice %112 {offsets = [0, 64], sizes = [8, 32], strides = [1, 1]} : vector<8x96xf32> to vector<8x32xf32>
      %131 = vector.broadcast %24 : vector<1x32xf32> to vector<8x32xf32>
      %132 = arith.addf %130, %131 : vector<8x32xf32>
      %133 = arith.mulf %120, %132 : vector<8x32xf32>
      %134 = arith.addf %129, %133 : vector<8x32xf32>
      %135 = math.tanh %134 : vector<8x32xf32>
      %cst_77 = arith.constant 1.000000e+00 : f32
      %136 = vector.broadcast %cst_77 : f32 to vector<8x32xf32>
      %137 = arith.subf %136, %128 : vector<8x32xf32>
      %138 = arith.mulf %137, %135 : vector<8x32xf32>
      %139 = arith.mulf %128, %arg26 : vector<8x32xf32>
      %140 = arith.addf %138, %139 : vector<8x32xf32>
      %141 = arith.addi %27, %107 : i32
      %142 = vector.broadcast %141 : i32 to vector<8x1xi32>
      %143 = arith.cmpi slt, %142, %0 : vector<8x1xi32>
      %144 = vector.broadcast %arg24 : i32 to vector<8x1xi32>
      %145 = arith.cmpi slt, %144, %36 : vector<8x1xi32>
      %cst_78 = arith.constant 0.000000e+00 : f32
      %146 = vector.shape_cast %143 : vector<8x1xi1> to vector<8x1xi1>
      %147 = vector.broadcast %146 : vector<8x1xi1> to vector<8x32xi1>
      %148 = vector.broadcast %cst_78 : f32 to vector<8x32xf32>
      %149 = arith.select %147, %140, %148 : vector<8x32xi1>, vector<8x32xf32>
      %150 = vector.shape_cast %145 : vector<8x1xi1> to vector<8x1xi1>
      %151 = vector.broadcast %150 : vector<8x1xi1> to vector<8x32xi1>
      %152 = arith.select %151, %149, %arg26 : vector<8x32xi1>, vector<8x32xf32>
      %cst_79 = arith.constant 0.000000e+00 : f32
      %153 = vector.shape_cast %145 : vector<8x1xi1> to vector<8x1xi1>
      %154 = vector.broadcast %153 : vector<8x1xi1> to vector<8x32xi1>
      %155 = vector.broadcast %cst_79 : f32 to vector<8x32xf32>
      %156 = arith.select %154, %149, %155 : vector<8x32xi1>, vector<8x32xf32>
      %157 = arith.addf %arg28, %156 : vector<8x32xf32>
      %158 = arith.maximumf %arg30, %149 : vector<8x32xf32>
      %159 = vector.shape_cast %145 : vector<8x1xi1> to vector<8x1xi1>
      %160 = vector.broadcast %159 : vector<8x1xi1> to vector<8x32xi1>
      %161 = arith.select %160, %158, %arg30 : vector<8x32xi1>, vector<8x32xf32>
      scf.yield %104, %152, %95, %157, %101, %161 : vector<8x32xf32>, vector<8x32xf32>, vector<8x32xf32>, vector<8x32xf32>, vector<8x32xf32>, vector<8x32xf32>
    }
    %c0_49 = arith.constant 0 : index
    %c0_50 = arith.constant 0 : index
    %46 = vector.load %arg16[%c0_49, %c0_50] : memref<8x32xf32, #tpu.memory_space<vmem>>, vector<8x32xf32>
    tpu.vector_store %arg16[%c0_49, %c0_50], %45#0 {strides = array<i32>} : memref<8x32xf32, #tpu.memory_space<vmem>>, vector<8x32xf32>,
    %c0_51 = arith.constant 0 : index
    %c0_52 = arith.constant 0 : index
    %47 = vector.load %arg17[%c0_51, %c0_52] : memref<8x32xf32, #tpu.memory_space<vmem>>, vector<8x32xf32>
    tpu.vector_store %arg17[%c0_51, %c0_52], %45#1 {strides = array<i32>} : memref<8x32xf32, #tpu.memory_space<vmem>>, vector<8x32xf32>,
    %c0_53 = arith.constant 0 : index
    %c0_54 = arith.constant 0 : index
    %48 = vector.load %arg18[%c0_53, %c0_54] : memref<8x32xf32, #tpu.memory_space<vmem>>, vector<8x32xf32>
    tpu.vector_store %arg18[%c0_53, %c0_54], %45#2 {strides = array<i32>} : memref<8x32xf32, #tpu.memory_space<vmem>>, vector<8x32xf32>,
    %c0_55 = arith.constant 0 : index
    %c0_56 = arith.constant 0 : index
    %49 = vector.load %arg19[%c0_55, %c0_56] : memref<8x32xf32, #tpu.memory_space<vmem>>, vector<8x32xf32>
    tpu.vector_store %arg19[%c0_55, %c0_56], %45#3 {strides = array<i32>} : memref<8x32xf32, #tpu.memory_space<vmem>>, vector<8x32xf32>,
    %c0_57 = arith.constant 0 : index
    %c0_58 = arith.constant 0 : index
    %50 = vector.load %arg20[%c0_57, %c0_58] : memref<8x32xf32, #tpu.memory_space<vmem>>, vector<8x32xf32>
    tpu.vector_store %arg20[%c0_57, %c0_58], %45#4 {strides = array<i32>} : memref<8x32xf32, #tpu.memory_space<vmem>>, vector<8x32xf32>,
    %c0_59 = arith.constant 0 : index
    %c0_60 = arith.constant 0 : index
    %51 = vector.load %arg21[%c0_59, %c0_60] : memref<8x32xf32, #tpu.memory_space<vmem>>, vector<8x32xf32>
    tpu.vector_store %arg21[%c0_59, %c0_60], %45#5 {strides = array<i32>} : memref<8x32xf32, #tpu.memory_space<vmem>>, vector<8x32xf32>,
    %c0_i32_61 = arith.constant 0 : i32
    %52 = arith.cmpi eq, %arg0, %c0_i32_61 : i32
    %53 = arith.extui %52 : i1 to i32
    %c0_i32_62 = arith.constant 0 : i32
    %54 = arith.cmpi ne, %53, %c0_i32_62 : i32
    scf.if %54 {
      %55 = arith.sitofp %3 : i32 to f32
      %cst_63 = arith.constant 1.000000e+00 : f32
      %56 = arith.divf %cst_63, %55 : f32
      %57 = vector.broadcast %56 : f32 to vector<8x32xf32>
      %58 = arith.mulf %45#2, %57 : vector<8x32xf32>
      %59 = vector.broadcast %56 : f32 to vector<8x32xf32>
      %60 = arith.mulf %45#3, %59 : vector<8x32xf32>
      %61 = tpu.concatenate %58, %60, %45#4, %45#5 in 1 : vector<8x32xf32>, vector<8x32xf32>, vector<8x32xf32>, vector<8x32xf32> -> vector<8x128xf32>
      %c0_64 = arith.constant 0 : index
      %c0_65 = arith.constant 0 : index
      %62 = vector.load %arg13[%c0_64, %c0_65] : memref<128x128xf32, #tpu.memory_space<vmem>>, vector<128x128xf32>
      %cst_66 = arith.constant dense<0.000000e+00> : vector<8x128xf32>
      %63 = tpu.matmul %61, %62, %cst_66 {dimension_numbers = #tpu.dot_dimension_numbers<[1], [0], [0], [1], [0, 0, 1, 1], [], []>} : vector<8x128xf32>, vector<128x128xf32>, vector<8x128xf32> -> vector<8x128xf32>
      %c0_67 = arith.constant 0 : index
      %c0_68 = arith.constant 0 : index
      %64 = vector.load %arg14[%c0_67, %c0_68] : memref<1x128xf32, #tpu.memory_space<vmem>>, vector<1x128xf32>
      %65 = vector.broadcast %64 : vector<1x128xf32> to vector<8x128xf32>
      %66 = arith.addf %63, %65 : vector<8x128xf32>
      %cst_69 = arith.constant dense<0xFF800000> : vector<8xf32>
      %67 = vector.multi_reduction <maximumf>, %66, %cst_69 [1] : vector<8x128xf32> to vector<8xf32>
      %68 = vector.shape_cast %67 : vector<8xf32> to vector<8x1xf32>
      %69 = vector.broadcast %68 : vector<8x1xf32> to vector<8x128xf32>
      %70 = arith.subf %66, %69 : vector<8x128xf32>
      %71 = math.exp %70 : vector<8x128xf32>
      %cst_70 = arith.constant dense<0.000000e+00> : vector<8xf32>
      %72 = vector.multi_reduction <add>, %71, %cst_70 [1] : vector<8x128xf32> to vector<8xf32>
      %73 = vector.shape_cast %72 : vector<8xf32> to vector<8x1xf32>
      %74 = math.log %73 : vector<8x1xf32>
      %75 = vector.broadcast %74 : vector<8x1xf32> to vector<8x128xf32>
      %76 = arith.subf %70, %75 : vector<8x128xf32>
      %c0_71 = arith.constant 0 : index
      %c0_72 = arith.constant 0 : index
      %77 = vector.load %arg15[%c0_71, %c0_72] : memref<8x128xf32, #tpu.memory_space<vmem>>, vector<8x128xf32>
      tpu.vector_store %arg15[%c0_71, %c0_72], %76 {strides = array<i32>} : memref<8x128xf32, #tpu.memory_space<vmem>>, vector<8x128xf32>,
    } else {
    }
    return
  }
  func.func @transform_0(%arg0: i32, %arg1: memref<8xi32, #tpu.memory_space<smem>>) -> (i32, i32) {
    %c0_i32 = arith.constant 0 : i32
    %c0_i32_0 = arith.constant 0 : i32
    %c0_i32_1 = arith.constant 0 : i32
    return %c0_i32, %c0_i32_0 : i32, i32
  }
  func.func @transform_1(%arg0: i32, %arg1: memref<8xi32, #tpu.memory_space<smem>>) -> (i32, i32) {
    %c0_i32 = arith.constant 0 : i32
    %c0_i32_0 = arith.constant 0 : i32
    return %arg0, %c0_i32 : i32, i32
  }
  func.func @transform_2(%arg0: i32, %arg1: memref<8xi32, #tpu.memory_space<smem>>) -> (i32, i32) {
    %c0_i32 = arith.constant 0 : i32
    %0 = arith.subi %c0_i32, %arg0 : i32
    %c0_i32_0 = arith.constant 0 : i32
    %c0_i32_1 = arith.constant 0 : i32
    return %0, %c0_i32_0 : i32, i32
  }
  func.func @transform_3(%arg0: i32, %arg1: memref<8xi32, #tpu.memory_space<smem>>) -> (i32, i32) {
    %c0_i32 = arith.constant 0 : i32
    %c0_i32_0 = arith.constant 0 : i32
    %c0_i32_1 = arith.constant 0 : i32
    return %c0_i32, %c0_i32_0 : i32, i32
  }
  func.func @transform_4(%arg0: i32, %arg1: memref<8xi32, #tpu.memory_space<smem>>) -> (i32, i32) {
    %c0_i32 = arith.constant 0 : i32
    %c0_i32_0 = arith.constant 0 : i32
    %c0_i32_1 = arith.constant 0 : i32
    return %c0_i32, %c0_i32_0 : i32, i32
  }
  func.func @transform_5(%arg0: i32, %arg1: memref<8xi32, #tpu.memory_space<smem>>) -> (i32, i32) {
    %c0_i32 = arith.constant 0 : i32
    %c0_i32_0 = arith.constant 0 : i32
    %c0_i32_1 = arith.constant 0 : i32
    return %c0_i32, %c0_i32_0 : i32, i32
  }
  func.func @transform_6(%arg0: i32, %arg1: memref<8xi32, #tpu.memory_space<smem>>) -> (i32, i32) {
    %c0_i32 = arith.constant 0 : i32
    %c0_i32_0 = arith.constant 0 : i32
    %c0_i32_1 = arith.constant 0 : i32
    return %c0_i32, %c0_i32_0 : i32, i32
  }
  func.func @transform_7(%arg0: i32, %arg1: memref<8xi32, #tpu.memory_space<smem>>) -> (i32, i32) {
    %c0_i32 = arith.constant 0 : i32
    %c0_i32_0 = arith.constant 0 : i32
    %c0_i32_1 = arith.constant 0 : i32
    return %c0_i32, %c0_i32_0 : i32, i32
  }
  func.func @transform_8(%arg0: i32, %arg1: memref<8xi32, #tpu.memory_space<smem>>) -> (i32, i32) {
    %c0_i32 = arith.constant 0 : i32
    %c0_i32_0 = arith.constant 0 : i32
    %c0_i32_1 = arith.constant 0 : i32
    return %c0_i32, %c0_i32_0 : i32, i32
  }
  func.func @transform_9(%arg0: i32, %arg1: memref<8xi32, #tpu.memory_space<smem>>) -> (i32, i32) {
    %c0_i32 = arith.constant 0 : i32
    %c0_i32_0 = arith.constant 0 : i32
    %c0_i32_1 = arith.constant 0 : i32
    return %c0_i32, %c0_i32_0 : i32, i32
  }
  func.func @transform_10(%arg0: i32, %arg1: memref<8xi32, #tpu.memory_space<smem>>) -> (i32, i32) {
    %c0_i32 = arith.constant 0 : i32
    %c0_i32_0 = arith.constant 0 : i32
    %c0_i32_1 = arith.constant 0 : i32
    return %c0_i32, %c0_i32_0 : i32, i32
  }
  func.func @transform_11(%arg0: i32, %arg1: memref<8xi32, #tpu.memory_space<smem>>) -> (i32, i32) {
    %c0_i32 = arith.constant 0 : i32
    %c0_i32_0 = arith.constant 0 : i32
    %c0_i32_1 = arith.constant 0 : i32
    return %c0_i32, %c0_i32_0 : i32, i32
  }
  func.func @transform_12(%arg0: i32, %arg1: memref<8xi32, #tpu.memory_space<smem>>) -> (i32, i32) {
    %c0_i32 = arith.constant 0 : i32
    %c0_i32_0 = arith.constant 0 : i32
    %c0_i32_1 = arith.constant 0 : i32
    return %c0_i32, %c0_i32_0 : i32, i32
  }
  func.func @transform_13(%arg0: i32, %arg1: memref<8xi32, #tpu.memory_space<smem>>) -> (i32, i32) {
    %c0_i32 = arith.constant 0 : i32
    %c0_i32_0 = arith.constant 0 : i32
    %c0_i32_1 = arith.constant 0 : i32
    return %c0_i32, %c0_i32_0 : i32, i32
  }
}

</mosaic_0001>

<bundles_post_ra>
// kernel: tpu_custom_call.1
= control target key start
LH: loop header
LB: loop body
LE: loop exit
PB: predicated region body
PF: predicated region fallthrough
CT: control target
= control target key end

     0   :  { %s1211_s16 = smov [#allocation11]   ;;  %s1692_s0 = inlined_call_operand.hbm [shape: s32[8], index: 0, kind: input, shape index: {}]   ;;  %s1693_s1 = inlined_call_operand.vmem [shape: s32[8,1], index: 1, kind: input, shape index: {}]   ;;  %s1694_s2 = inlined_call_operand.vmem [shape: f32[64,16], index: 2, kind: input, shape index: {}]   ;;  %s1695_s3 = inlined_call_operand.vmem [shape: f32[64,16], index: 3, kind: input, shape index: {}]   ;;  %s1696_s4 = inlined_call_operand.hbm [shape: f32[16,96], index: 4, kind: input, shape index: {}]   ;;  %s1697_s5 = inlined_call_operand.hbm [shape: f32[32,96], index: 5, kind: input, shape index: {}]   ;;  %s1698_s6 = inlined_call_operand.hbm [shape: f32[1,96], index: 6, kind: input, shape index: {}]   ;;  %s1699_s7 = inlined_call_operand.hbm [shape: f32[1,32], index: 7, kind: input, shape index: {}]   ;;  %s1700_s8 = inlined_call_operand.hbm [shape: f32[16,96], index: 8, kind: input, shape index: {}]   ;;  %s1701_s9 = inlined_call_operand.vmem [shape: f32[32,96], index: 9, kind: input, shape index: {}]   ;;  %s1702_s10 = inlined_call_operand.vmem [shape: f32[1,96], index: 10, kind: input, shape index: {}]   ;;  %s1703_s11 = inlined_call_operand.vmem [shape: f32[1,32], index: 11, kind: input, shape index: {}]   ;;  %s1704_s12 = inlined_call_operand.vmem [shape: f32[128,128], index: 12, kind: input, shape index: {}]   ;;  %s1705_s13 = inlined_call_operand.vmem [shape: f32[1,128], index: 13, kind: input, shape index: {}]   ;;  %s1706_s14 = inlined_call_operand.hbm [shape: f32[8,128], index: 14, kind: output, shape index: {}]  }
   0x1   :  { %s20_s15 = sshll.u32 %s1692_s0, 4  ;;  %s21_s15 = int_to_ptr.hbm [resolvable:$true] %s20_s15 }
   0x2   :  { %23 = dma.hbm_to_smem %s21_s15, 16, %s1211_s16, [#allocation10] }
   0x3   :  { %1149 = dma.done.wait [#allocation10], 16 }
   0x4   :  { %1150 = vsyncadd [#allocation10], 4294967280 }
   0x5   :  { %26 = sfence }
   0x6   :  { %27 = vsyncpa [#allocation13], 0 }
   0x7   :  { %28 = vsyncpa [#allocation16], 0 }
   0x8   :  { %29 = vsyncpa [#allocation19], 0 }
   0x9   :  { %30 = vsyncpa [#allocation14], 0  ;;  %s62_s19 = sshll.u32 %s1697_s5, 4  ;;  %s1212_s20 = smov [#allocation15]   ;;  %s63_s19 = int_to_ptr.hbm [resolvable:$true] %s62_s19 }
   0xa   :  { %s64_s21 = sshll.u32 %s1212_s20, 4  ;;  %s87_s23 = sshll.u32 %s1699_s7, 4  ;;  %s65_s21 = int_to_ptr.vmem [resolvable:$true] %s64_s21  ;;  %s88_s23 = int_to_ptr.hbm [resolvable:$true] %s87_s23 }
   0xb   :  { %s1213_s24 = smov 128   ;;  %s1214_s25 = smov 8  }
   0xc   :  { %70 = dma.hbm_to_vmem [thread:$0]  %s63_s19, 512, %s65_s21, [#allocation16], %s1213_s24, %s1213_s24, %s1214_s25  }
   0xd   :  { %s1215_s26 = smov [#allocation18]   ;;  %s49_s30 = sshll.u32 %s1696_s4, 4  ;;  %s50_s30 = int_to_ptr.hbm [resolvable:$true] %s49_s30 }
   0xe   :  { %s89_s27 = sshll.u32 %s1215_s26, 4  ;;  %s76_s16 = sshll.u32 %s1698_s6, 4  ;;  %s90_s27 = int_to_ptr.vmem [resolvable:$true] %s89_s27  ;;  %s77_s16 = int_to_ptr.hbm [resolvable:$true] %s76_s16 }
   0xf   :  { %92 = dma.hbm_to_vmem [thread:$0]  %s88_s23, 16, %s90_s27, [#allocation19]  }
  0x10   :  { %s1216_s17 = smov [#allocation12]   ;;  %s1217_s7 = smov [#allocation17]  }
  0x11   :  { %s51_s18 = sshll.u32 %s1216_s17, 4  ;;  %s78_s19 = sshll.u32 %s1217_s7, 4  ;;  %s52_s18 = int_to_ptr.vmem [resolvable:$true] %s51_s18  ;;  %s79_s19 = int_to_ptr.vmem [resolvable:$true] %s78_s19 }
  0x12   :  { %57 = dma.hbm_to_vmem [thread:$0]  %s50_s30, 256, %s52_s18, [#allocation13], %s1213_s24, %s1213_s24, %s1214_s25  }
  0x13   :  { %s97_s22 = sshll.u32 %s1700_s8, 4  ;;  %s1218_s4 = smov [#allocation20]   ;;  %s98_s22 = int_to_ptr.hbm [resolvable:$true] %s97_s22 }
  0x14   :  { %81 = dma.hbm_to_vmem [thread:$0]  %s77_s16, 16, %s79_s19, [#allocation16]  }
  0x15   :  { %s99_s0 = sshll.u32 %s1218_s4, 4  ;;  %s100_s0 = int_to_ptr.vmem [resolvable:$true] %s99_s0 }
  0x16   :  { %105 = dma.hbm_to_vmem [thread:$0]  %s98_s22, 256, %s100_s0, [#allocation19], %s1213_s24, %s1213_s24, %s1214_s25  }
  0x17   :  { %1151 = dma.done.wait [#allocation13], 256  }
  0x18   :  { %1152 = vsyncadd [#allocation13], 4294967040 }
  0x19   :  { %1153 = dma.done.wait [#allocation16], 528  }
  0x1a   :  { %1154 = vsyncadd [#allocation16], 4294966768 }
  0x1b   :  { %1155 = dma.done.wait [#allocation19], 272  }
  0x1c   :  { %1156 = vsyncadd [#allocation19], 4294967024  ;;  %vm160_vm0 = vcmask 261120   ;;  %s151_s6 = sld [smem:[#allocation11]]  ;;  %v1219_v0 = vmov 0.0   ;;  %v1220_v1 = vmov -inf  }
  0x1d   :  { %161 = vst.msk [vmem:[#allocation2] sm:$0xff] %vm160_vm0, %v1219_v0  ;;  %v1331_v2 = vld [vmem:[%s1693_s1] sm:$0xff]  ;;  %v1335_v4 = vld [vmem:[#allocation15 + $0x8] sm:$0xff]  ;;  %v1337_v5 = vld [vmem:[#allocation15 + $0x10] sm:$0xff]  ;;  %vm181_vm1 = vcmask 130048   ;;  %vm247_vm2 = vcmask 785408  }
  0x1e   :  { %162 = vst.msk [vmem:[#allocation3] sm:$0xff] %vm160_vm0, %v1219_v0  ;;  %v1333_v3 = vld [vmem:[#allocation15] sm:$0xff]  ;;  %v1339_v6 = vld [vmem:[#allocation15 + $0x18] sm:$0xff]  ;;  %v1351_v9 = vld [vmem:[%s1701_s9 + $0x8] sm:$0xff] }
  0x1f   :  { %163 = vst.msk [vmem:[#allocation4] sm:$0xff] %vm160_vm0, %v1219_v0  ;;  %v1341_v7 = vld [vmem:[#allocation18] sm:$0x1]  ;;  %v1356_v10 = vld [vmem:[%s1701_s9 + $0x10] sm:$0xff]  ;;  %v1361_v11 = vld [vmem:[%s1701_s9 + $0x18] sm:$0xff] }
  0x20   :  { %164 = vst.msk [vmem:[#allocation5] sm:$0xff] %vm160_vm0, %v1219_v0  ;;  %v1346_v8 = vld [vmem:[%s1701_s9] sm:$0xff]  ;;  %v176_v18 = vld [vmem:[#allocation12 + $0x8] sm:$0xff]  ;;  %v265_v19 = vld [vmem:[#allocation20 + $0x8] sm:$0xff] }
  0x21   :  { %165 = vst.msk [vmem:[#allocation6] sm:$0xff] %vm160_vm0, %v1220_v1  ;;  %v1366_v12 = vld [vmem:[%s1703_s11] sm:$0x1]  ;;  %789 = vmatpush.msra.mxu2 %v176_v18  ;;  %791 = vmatpush.msra.mxu3 %v265_v19  ;;  %v175_v22 = vld [vmem:[#allocation12] sm:$0xff]  ;;  %v264_v23 = vld [vmem:[#allocation20] sm:$0xff] }
  0x22   :  { %166 = vst.msk [vmem:[#allocation7] sm:$0xff] %vm160_vm0, %v1220_v1  ;;  %p152_p0 = scmp.gt.s32.totalorder %s151_s6, 1  ;;  %p744_p1 = scmp.lt.s32.totalorder %s151_s6, 8  ;;  %v171_v24 = vld [vmem:[%s1694_s2 + $0x20] sm:$0xff]  ;;  %220 = vmatpush.msra.mxu0 %v176_v18  ;;  %308 = vmatpush.msra.mxu1 %v265_v19  ;;  %v172_v29 = vld [vmem:[%s1694_s2 + $0x28] sm:$0xff]  ;;  %v173_v33 = vld [vmem:[%s1694_s2 + $0x30] sm:$0xff] }
  0x23   :  { %v260_v25 = vld [vmem:[%s1695_s3 + $0x20] sm:$0xff]  ;;  %790 = vmatpush.msra.mxu2 %v175_v22  ;;  %792 = vmatpush.msra.mxu3 %v264_v23  ;;  %v261_v30 = vld [vmem:[%s1695_s3 + $0x28] sm:$0xff]  ;;  %v262_v34 = vld [vmem:[%s1695_s3 + $0x30] sm:$0xff] }
  0x24   :  { %s1728_s6 = smov (!%p152_p0, %s151_s6), 1  ;;  %v1368_v13 = vld [vmem:[#allocation2] sm:$0xff]   ;;  %753 = vmatmul.msk.f32.vlgmr.msra.gmra.mxu2 %vm181_vm1, %v171_v24  ;;  %761 = vmatmul.msk.f32.vlgmr.msra.gmra.mxu3 %vm181_vm1, %v260_v25  ;;  %v168_v31 = vld [vmem:[%s1694_s2 + $0x8] sm:$0xff]  ;;  %v169_v35 = vld [vmem:[%s1694_s2 + $0x10] sm:$0xff] }
  0x25   :  { %s1730_s6 = smov (!%p744_p1, %s1728_s6), 8  ;;  %v1372_v14 = vld [vmem:[#allocation3] sm:$0xff]   ;;  %v167_v26 = vld [vmem:[%s1694_s2] sm:$0xff]  ;;  %221 = vmatpush.msra.mxu0 %v175_v22  ;;  %309 = vmatpush.msra.mxu1 %v264_v23  ;;  %v258_v36 = vld [vmem:[%s1695_s3 + $0x10] sm:$0xff] }
  0x26   :  { %v1374_v15 = vld [vmem:[#allocation4] sm:$0xff]   ;;  %p357_p2 = scmp.gt.s32.totalorder %s1730_s6, 0  ;;  %p765_p3 = scmp.lt.s32.totalorder %s1730_s6, 8  ;;  %v368_v20 = vstv %s1730_s6  ;;  %v256_v27 = vld [vmem:[%s1695_s3] sm:$0xff]  ;;  %749 = vmatmul.msk.f32.vlgmr.msra.gmra.mxu0 %vm181_vm1, %v167_v26  ;;  %v257_v32 = vld [vmem:[%s1695_s3 + $0x8] sm:$0xff] }
  0x27   :  { %v1376_v16 = vld [vmem:[#allocation5] sm:$0xff]   ;;  %757 = vmatmul.msk.f32.vlgmr.msra.gmra.mxu1 %vm181_vm1, %v256_v27  ;;  %v917_v41 = vld [vmem:[#allocation17] ss:$0 sm:$0xff] }
  0x28   :  { %v1378_v17 = vld [vmem:[#allocation6] sm:$0xff]   ;;  %s358_s18 = scalar_select %p357_p2, %s1730_s6, 0  ;;  %v174_v37 = vld [vmem:[%s1694_s2 + $0x38] sm:$0xff] }
  0x29   :  { %v1383_v21 = vld [vmem:[#allocation7] sm:$0xff]   ;;  %v263_v38 = vld [vmem:[%s1695_s3 + $0x38] sm:$0xff]  ;;  %v918_v42 = vld [vmem:[%s1702_s10] ss:$0 sm:$0xff] }
  0x2a   :  { %s1732_s18 = smov (!%p765_p3, %s358_s18), 8  ;;  %v170_v39 = vld [vmem:[%s1694_s2 + $0x18] sm:$0xff] }
  0x2b   :  { %v369_v28 = vstv %s1732_s18  ;;  %v259_v40 = vld [vmem:[%s1695_s3 + $0x18] sm:$0xff]  ;;  %p775_p4 = scmp.le.s32.totalorder %s1732_s18, 0 }
  0x2c   :  { %754 = vmatmul.msk.f32.gmra.mxu2 %vm181_vm1, %v172_v29  ;;  %762 = vmatmul.msk.f32.gmra.mxu3 %vm181_vm1, %v261_v30  ;;  %v1707_v30 = vmov %v1383_v21  ;;  %s1511_s2 = smov (!%p775_p4), 0  }
  0x2e   :  { %750 = vmatmul.msk.f32.gmra.mxu0 %vm181_vm1, %v168_v31  ;;  %v1708_v31 = vmov %v1378_v17 }
  0x2f   :  { %758 = vmatmul.msk.f32.gmra.mxu1 %vm181_vm1, %v257_v32  ;;  %v1709_v32 = vmov %v1376_v16 }
  0x34   :  { %755 = vmatmul.msk.f32.gmra.mxu2 %vm181_vm1, %v173_v33  ;;  %763 = vmatmul.msk.f32.gmra.mxu3 %vm181_vm1, %v262_v34  ;;  %v1710_v33 = vmov %v1374_v15  ;;  %v1711_v34 = vmov %v1372_v14 }
  0x36   :  { %751 = vmatmul.msk.f32.gmra.mxu0 %vm181_vm1, %v169_v35  ;;  %v1712_v35 = vmov %v1368_v13 }
  0x37   :  { %759 = vmatmul.msk.f32.gmra.mxu1 %vm181_vm1, %v258_v36 }
  0x3c   :  { %756 = vmatmul.msk.f32.gmra.mxu2 %vm181_vm1, %v174_v37  ;;  %764 = vmatmul.msk.f32.gmra.mxu3 %vm181_vm1, %v263_v38 }
  0x3e   :  { %752 = vmatmul.msk.f32.gmra.mxu0 %vm181_vm1, %v170_v39 }
  0x3f   :  { %760 = vmatmul.msk.f32.gmra.mxu1 %vm181_vm1, %v259_v40 }
  0xa3   :  { %v223_v43 = vpop.f32.mrf.mxu0 }
  0xa4   :  { %v311_v44 = vpop.f32.mrf.mxu1  ;;  %v224_v45 = vadd.f32 %v917_v41, %v223_v43 }
  0xa5   :  { %v312_v46 = vadd.f32 %v918_v42, %v311_v44 }
  0xa6   :  { %248 = vst.msk [vmem:[#allocation8] sm:$0xff] %vm247_vm2, %v224_v45 }
  0xa7   :  { %v235_v47 = vpop.f32.mrf.mxu2  ;;  %335 = vst.msk [vmem:[#allocation9] sm:$0xff] %vm247_vm2, %v312_v46  ;;  %v323_v48 = vpop.f32.mrf.mxu3 }
  0xa8   :  { %v236_v49 = vadd.f32 %v917_v41, %v235_v47  ;;  %v324_v50 = vadd.f32 %v918_v42, %v323_v48 }
  0xaa   :  { %252 = vst.msk [vmem:[#allocation8 + $0x20] sm:$0xff] %vm247_vm2, %v236_v49 }
  0xab   :  { %339 = vst.msk [vmem:[#allocation9 + $0x20] sm:$0xff] %vm247_vm2, %v324_v50  ;;  %v226_v51 = vpop.f32.mrf.mxu0 }
  0xac   :  { %v314_v52 = vpop.f32.mrf.mxu1  ;;  %v227_v53 = vadd.f32 %v917_v41, %v226_v51 }
  0xad   :  { %v315_v54 = vadd.f32 %v918_v42, %v314_v52 }
  0xae   :  { %249 = vst.msk [vmem:[#allocation8 + $0x8] sm:$0xff] %vm247_vm2, %v227_v53 }
  0xaf   :  { %v238_v55 = vpop.f32.mrf.mxu2  ;;  %336 = vst.msk [vmem:[#allocation9 + $0x8] sm:$0xff] %vm247_vm2, %v315_v54  ;;  %v326_v56 = vpop.f32.mrf.mxu3 }
  0xb0   :  { %v239_v57 = vadd.f32 %v917_v41, %v238_v55  ;;  %v327_v58 = vadd.f32 %v918_v42, %v326_v56 }
  0xb2   :  { %253 = vst.msk [vmem:[#allocation8 + $0x28] sm:$0xff] %vm247_vm2, %v239_v57 }
  0xb3   :  { %340 = vst.msk [vmem:[#allocation9 + $0x28] sm:$0xff] %vm247_vm2, %v327_v58  ;;  %v229_v59 = vpop.f32.mrf.mxu0 }
  0xb4   :  { %v317_v60 = vpop.f32.mrf.mxu1  ;;  %v230_v61 = vadd.f32 %v917_v41, %v229_v59 }
  0xb5   :  { %v318_v62 = vadd.f32 %v918_v42, %v317_v60 }
  0xb6   :  { %250 = vst.msk [vmem:[#allocation8 + $0x10] sm:$0xff] %vm247_vm2, %v230_v61 }
  0xb7   :  { %v241_v63 = vpop.f32.mrf.mxu2  ;;  %337 = vst.msk [vmem:[#allocation9 + $0x10] sm:$0xff] %vm247_vm2, %v318_v62  ;;  %v329_v0 = vpop.f32.mrf.mxu3 }
  0xb8   :  { %v242_v1 = vadd.f32 %v917_v41, %v241_v63  ;;  %v330_v18 = vadd.f32 %v918_v42, %v329_v0 }
  0xba   :  { %254 = vst.msk [vmem:[#allocation8 + $0x30] sm:$0xff] %vm247_vm2, %v242_v1 }
  0xbb   :  { %341 = vst.msk [vmem:[#allocation9 + $0x30] sm:$0xff] %vm247_vm2, %v330_v18  ;;  %v232_v19 = vpop.f32.mrf.mxu0 }
  0xbc   :  { %v320_v22 = vpop.f32.mrf.mxu1  ;;  %v233_v23 = vadd.f32 %v917_v41, %v232_v19 }
  0xbd   :  { %v321_v24 = vadd.f32 %v918_v42, %v320_v22 }
  0xbe   :  { %251 = vst.msk [vmem:[#allocation8 + $0x18] sm:$0xff] %vm247_vm2, %v233_v23 }
  0xbf   :  { %v244_v25 = vpop.f32.mrf.mxu2  ;;  %338 = vst.msk [vmem:[#allocation9 + $0x18] sm:$0xff] %vm247_vm2, %v321_v24  ;;  %v332_v26 = vpop.f32.mrf.mxu3  ;;  %729 = sbr.rel (%p775_p4) target bundleno = 800 (0x320), region = 106 }
  0xc0   :  { %v245_v27 = vadd.f32 %v917_v41, %v244_v25  ;;  %v333_v29 = vadd.f32 %v918_v42, %v332_v26 }
  0xc2   :  { %255 = vst.msk [vmem:[#allocation8 + $0x38] sm:$0xff] %vm247_vm2, %v245_v27 }
  0xc3   :  { %342 = vst.msk [vmem:[#allocation9 + $0x38] sm:$0xff] %vm247_vm2, %v333_v29 }
  0xc4 LB: > { %407 = vmatpush.msra.mxu0 %v1339_v6  ;;  %505 = vmatpush.msra.mxu1 %v1361_v11  ;;  %v436_v36 = vperm.slane %v1341_v7, 0  ;;  %s1221_s3 = smov 64   ;;  %v534_v37 = vperm.slane %v1366_v12, 0  ;;  %s1222_s10 = smov 32   ;;  %v464_v32 = vstv %s1185_s2  ;;  %v1223_v33 = vmov 0   ;;  %s1185_s2 = sphi %s1511_s2, %s379_s2   ;;  %v1181_v13 = vphi %v1368_v13, %v1720_v13   ;;  %v1177_v14 = vphi %v1372_v14, %v1719_v14   ;;  %v1173_v15 = vphi %v1374_v15, %v1718_v15   ;;  %v1169_v16 = vphi %v1376_v16, %v1717_v16   ;;  %v1165_v17 = vphi %v1378_v17, %v1716_v17   ;;  %v1161_v21 = vphi %v1383_v21, %v1715_v21  }
  0xc5   : > { %s779_s8 = sadd.s32 4294967295, %s1732_s18  ;;  %s776_s24 = sshll.u32 %s1185_s2, 3  ;;  %vm465_vm11 = vcmp.lt.s32.totalorder %v464_v32, %v1331_v2  ;;  %919 = vset.pattern.permute.xlu1 %v1223_v33  ;;  %920 = vset.pattern.permute.xlu2 %v1223_v33  ;;  %vm1569_vm15 = vcmp.lt.s32.totalorder %v464_v32, %v369_v28  ;;  %vm477_vm1 = vcmp.lt.s32.totalorder %v464_v32, %v368_v20 }
  0xc6   : > { %408 = vmatpush.msra.mxu0 %v1337_v5  ;;  %506 = vmatpush.msra.mxu1 %v1356_v10  ;;  %s484_s23 = ssub.s32 %s779_s8, %s1185_s2  ;;  %s389_s25 = scalar_lea.vmem [#allocation8], %s776_s24  ;;  %v466_v34 = vsel %vm465_vm11, 1, %v1223_v33 }
  0xc7   : > { %437 = vrot.lane.b32.xlu0 %v436_v36, %s1221_s3  ;;  %p485_p5 = scmp.gt.s32.totalorder %s484_s23, 0  ;;  %s1224_s27 = smov 96  }
  0xc8   : > { %409 = vmatpush.msra.mxu0 %v1335_v4  ;;  %507 = vmatpush.msra.mxu1 %v1351_v9  ;;  %s379_s2 = sadd.s32 1, %s1185_s2  }
  0xc9   : > { %s1734_s23 = smov (!%p485_p5, %s484_s23), 0  ;;  %v390_v44 = vld [vmem:[%s389_s25] sm:$0xff]  ;;  %921 = vset.pattern.permute.xlu0 %v1223_v33  ;;  %p378_p6 = scmp.ge.s32.totalorder %s379_s2, %s1732_s18 }
  0xca   : > { %410 = vmatpush.msra.mxu0 %v1333_v3  ;;  %508 = vmatpush.msra.mxu1 %v1346_v8  ;;  %s780_s1 = sshll.u32 %s1734_s23, 3 }
  0xcb   : > { %777 = vmatmul.msk.f32.vlgmr.msra.gmra.mxu0 %vm160_vm0, %v1181_v13  ;;  %781 = vmatmul.msk.f32.vlgmr.msra.gmra.mxu1 %vm160_vm0, %v1177_v14  ;;  %s488_s26 = scalar_lea.vmem [#allocation9], %s780_s1 }
  0xcc   : > { %v489_v47 = vld [vmem:[%s488_s26] sm:$0xff] }
  0xcf   : > { %535 = vrot.lane.b32.xlu0 %v534_v37, %s1221_s3 }
 0x139   : > { %v438_v38 = vpop.permute.xlu0 %437 }
 0x141   : > { %v536_v41 = vpop.permute.xlu0 %535 }
 0x148   : > { %v412_v39 = vpop.f32.mrf.mxu0  ;;  %v510_v42 = vpop.f32.mrf.mxu1 }
 0x149   : > { %v440_v40 = vadd.f32 %v438_v38, %v412_v39  ;;  %v538_v43 = vadd.f32 %v536_v41, %v510_v42  ;;  %v415_v45 = vadd.f32 %v412_v39, %v390_v44  ;;  %v513_v48 = vadd.f32 %v510_v42, %v489_v47 }
 0x14a   : > { %v562_v41 = vstv %s1734_s23 }
 0x14b   : > { %442 = vrot.lane.b32.xlu1 %v440_v40, %s1221_s3  ;;  %v778_v46 = vmul.f32 -1.442695, %v415_v45  ;;  %v782_v49 = vmul.f32 -1.442695, %v513_v48  ;;  %vm563_vm12 = vcmp.lt.s32.totalorder %v562_v41, %v1331_v2 }
 0x14c   : > { %v566_v42 = vsel %vm563_vm12, 1, %v1223_v33 }
 0x14d   : > { %922 = vpow2.f32 %v778_v46 }
 0x14e   : > { %924 = vpow2.f32 %v782_v49 }
 0x153   : > { %540 = vrot.lane.b32.xlu1 %v538_v43, %s1221_s3  ;;  %v923_v50 = vpop.eup %922 }
 0x154   : > { %v925_v51 = vpop.eup %924 }
 0x155   : > { %v517_v52 = vadd.f32 1.0, %v925_v51 }
 0x157   : > { %vm523_vm7 = vweird.f32 %v517_v52  ;;  %v529_v22 = vand.u32 2147483648, %v517_v52  ;;  %v527_v25 = vand.u32 2147483647, %v517_v52 }
 0x159   : > { %v530_v26 = vor.u32 1.1754944e-38, %v529_v22  ;;  %vm528_vm10 = vcmp.eq.f32.partialorder %v527_v25, 8.507059e+37 }
 0x15b   : > { %458 = vrot.lane.b32.xlu1 %v1181_v13, %s1222_s10  ;;  %v419_v13 = vadd.f32 1.0, %v923_v50 }
 0x15d   : > { %926 = vrcp.f32 %v419_v13  ;;  %v431_v61 = vand.u32 2147483648, %v419_v13  ;;  %vm425_vm4 = vweird.f32 %v419_v13  ;;  %v429_v62 = vand.u32 2147483647, %v419_v13 }
 0x15e   : > { %928 = vrcp.f32 %v517_v52 }
 0x15f   : > { %v432_v1 = vor.u32 1.1754944e-38, %v431_v61  ;;  %vm430_vm6 = vcmp.eq.f32.partialorder %v429_v62, 8.507059e+37 }
 0x163   : > { %v927_v53 = vpop.eup %926  ;;  %468 = vperm.xlu1 %919, %v466_v34  }
 0x164   : > { %v421_v54 = vmul.f32 %v927_v53, %v419_v13  ;;  %v929_v56 = vpop.eup %928  ;;  %vm426_vm3 = vweird.f32 %v927_v53 }
 0x165   : > { %v519_v58 = vmul.f32 %v929_v56, %v517_v52  ;;  %vm427_vm5 = vmor %vm425_vm4, %vm426_vm3  ;;  %vm524_vm8 = vweird.f32 %v929_v56 }
 0x166   : > { %v422_v55 = vsub.f32 1.0, %v421_v54  ;;  %vm525_vm9 = vmor %vm523_vm7, %vm524_vm8 }
 0x167   : > { %v520_v60 = vsub.f32 1.0, %v519_v58 }
 0x168   : > { %v423_v57 = vmul.f32 %v927_v53, %v422_v55 }
 0x169   : > { %v521_v0 = vmul.f32 %v929_v56, %v520_v60 }
 0x16a   : > { %v424_v59 = vadd.f32 %v927_v53, %v423_v57 }
 0x16b   : > { %v522_v24 = vadd.f32 %v929_v56, %v521_v0 }
 0x16c   : > { %v428_v63 = vsel %vm427_vm5, %v927_v53, %v424_v59 }
 0x16d   : > { %v433_v19 = vsel %vm430_vm6, %v432_v1, %v428_v63  ;;  %v526_v27 = vsel %vm525_vm9, %v929_v56, %v522_v24 }
 0x16e   : > { %v531_v30 = vsel %vm528_vm10, %v530_v26, %v526_v27  ;;  %v452_v45 = vsub.f32 1.0, %v433_v19 }
 0x1bd   : > { %v443_v18 = vpop.permute.xlu1 %442 }
 0x1be   : > { %v445_v23 = vmul.f32 %v443_v18, %v433_v19 }
 0x1c0   : > { %447 = vrot.lane.b32.xlu2 %v445_v23, %s1221_s3 }
 0x1c5   : > { %v541_v29 = vpop.permute.xlu1 %540 }
 0x1c6   : > { %v543_v31 = vmul.f32 %v541_v29, %v531_v30 }
 0x1c8   : > { %545 = vrot.lane.b32.xlu2 %v543_v31, %s1221_s3 }
 0x1cd   : > { %v459_v43 = vpop.permute.xlu1 %458 }
 0x1ce   : > { %v461_v48 = vmul.f32 %v459_v43, %v433_v19 }
 0x1d5   : > { %v469_v46 = vpop.permute.xlu1 %468 }
 0x1d6   : > { %vm470_vm13 = vcmp.eq.s32.totalorder %v469_v46, 1 }
 0x21a   : > { %v448_v35 = vpop.permute.xlu2 %447 }
 0x21b   : > { %v450_v36 = vadd.f32 %v448_v35, %v390_v44 }
 0x21d   : > { %930 = vtanh.f32 %v450_v36 }
 0x222   : > { %v546_v37 = vpop.permute.xlu2 %545 }
 0x223   : > { %v931_v38 = vpop.eup %930  ;;  %v548_v39 = vadd.f32 %v546_v37, %v489_v47 }
 0x224   : > { %454 = vrot.lane.b32.xlu0 %v931_v38, %s1224_s27 }
 0x225   : > { %932 = vtanh.f32 %v548_v39 }
 0x22b   : > { %v933_v40 = vpop.eup %932 }
 0x22c   : > { %556 = vrot.lane.b32.xlu0 %v1177_v14, %s1222_s10  ;;  %552 = vrot.lane.b32.xlu2 %v933_v40, %s1224_s27  ;;  %v550_v14 = vsub.f32 1.0, %v531_v30 }
 0x234   : > { %568 = vperm.xlu2 %920, %v566_v42  }
 0x286   : > { %v553_v44 = vpop.permute.xlu2 %552 }
 0x287   : > { %v555_v53 = vmul.f32 %v553_v44, %v550_v14 }
 0x28e   : > { %v569_v51 = vpop.permute.xlu2 %568 }
 0x28f   : > { %vm570_vm14 = vcmp.eq.s32.totalorder %v569_v51, 1 }
 0x296   : > { %v455_v47 = vpop.permute.xlu0 %454 }
 0x297   : > { %v457_v49 = vmul.f32 %v455_v47, %v452_v45 }
 0x299   : > { %v462_v50 = vadd.f32 %v461_v48, %v457_v49 }
 0x29b   : > { %v471_v13 = vsel %vm470_vm13, %v462_v50, 0.0  ;;  %v482_v58 = vsel %vm470_vm13, %v462_v50, %v459_v43 }
 0x29c   : > { %473 = vrot.lane.b32.xlu0 %v471_v13, %s1224_s27 }
 0x29e   : > { %v557_v52 = vpop.permute.xlu0 %556 }
 0x29f   : > { %v559_v54 = vmul.f32 %v557_v52, %v531_v30 }
 0x2a1   : > { %v560_v55 = vadd.f32 %v559_v54, %v555_v53 }
 0x2a3   : > { %v571_v57 = vsel %vm570_vm14, %v560_v55, 0.0 }
 0x2a4   : > { %588 = vrot.lane.b32.xlu0 %v482_v58, %s1224_s27  ;;  %582 = vrot.lane.b32.xlu1 %v571_v57, %s1224_s27  ;;  %v575_v59 = vsel %vm1569_vm15, %v571_v57, 0.0  ;;  %v574_v60 = vsel %vm1569_vm15, %v571_v57, %v557_v52 }
 0x2a5   : > { %577 = vrot.lane.b32.xlu2 %v575_v59, %s1224_s27 }
 0x2ac   : > { %592 = vrot.lane.b32.xlu1 %v574_v60, %s1224_s27 }
 0x2ff   : > { %v578_v61 = vpop.permute.xlu2 %577 }
 0x300   : > { %v580_v62 = vadd.f32 %v1169_v16, %v578_v61  }
 0x302   : > { %v1717_v16 = vmov %v580_v62  ;;  %v1723_v32 = vmov (%p378_p6), %v580_v62 }
 0x30e   : > { %v474_v63 = vpop.permute.xlu0 %473 }
 0x30f   : > { %v476_v0 = vadd.f32 %v1173_v15, %v474_v63   ;;  %v478_v1 = vmax.f32 %v1165_v17, %v474_v63 }
 0x311   : > { %v481_v18 = vsel %vm477_vm1, %v478_v1, %v1165_v17   ;;  %v1718_v15 = vmov %v476_v0  ;;  %v1724_v33 = vmov (%p378_p6), %v476_v0 }
 0x312   : > { %v1716_v17 = vmov %v481_v18  ;;  %v1722_v31 = vmov (%p378_p6), %v481_v18 }
 0x316   : > { %v589_v19 = vpop.permute.xlu0 %588   ;;  %v583_v22 = vpop.permute.xlu1 %582 }
 0x317   : > { %v585_v23 = vmax.f32 %v1161_v21, %v583_v22  ;;  %v1720_v13 = vmov %v589_v19  ;;  %v1726_v35 = vmov (%p378_p6), %v589_v19 }
 0x319   : > { %v586_v24 = vsel %vm1569_vm15, %v585_v23, %v1161_v21  }
 0x31a   : > { %v1715_v21 = vmov %v586_v24  ;;  %v1721_v30 = vmov (%p378_p6), %v586_v24 }
 0x31b   :  { %381 = sbr.rel (!%p378_p6) target bundleno = 196 (0xc4), region = 112 }
 0x31e   : > { %v593_v25 = vpop.permute.xlu1 %592  }
 0x31f   : > { %v1719_v14 = vmov %v593_v25  ;;  %v1725_v34 = vmov (%p378_p6), %v593_v25 }
 0x320 PF:  { %596 = vst.msk [vmem:[#allocation2] sm:$0xff] %vm160_vm0, %v1209_v35  ;;  %s605_s18 = scvt.s32.f32 %s1730_s6  ;;  %s1225_s28 = smov 96   ;;  %v656_v15 = vld [vmem:[%s1704_s12 + $0x78] sm:$0xff]  ;;  %v655_v16 = vld [vmem:[%s1704_s12 + $0x70] sm:$0xff]  ;;  %v654_v17 = vld [vmem:[%s1704_s12 + $0x68] sm:$0xff]  ;;  %vm638_vm7 = vcmask 523264   ;;  %v1209_v35 = vphi %v1712_v35, %v1726_v35   ;;  %v1205_v34 = vphi %v1711_v34, %v1725_v34   ;;  %v1201_v33 = vphi %v1710_v33, %v1724_v33   ;;  %v1197_v32 = vphi %v1709_v32, %v1723_v32   ;;  %v1193_v31 = vphi %v1708_v31, %v1722_v31   ;;  %v1189_v30 = vphi %v1707_v30, %v1721_v30  }
 0x321   :  { %597 = vst.msk [vmem:[#allocation3] sm:$0xff] %vm160_vm0, %v1205_v34  ;;  %634 = vrot.lane.b32.xlu1 %v1189_v30, %s1225_s28  ;;  %661 = vmatpush.msra.mxu0 %v656_v15  ;;  %v653_v20 = vld [vmem:[%s1704_s12 + $0x60] sm:$0xff]  ;;  %v652_v21 = vld [vmem:[%s1704_s12 + $0x58] sm:$0xff]  ;;  %v651_v28 = vld [vmem:[%s1704_s12 + $0x50] sm:$0xff]  ;;  %s1226_s1 = smov 32   ;;  %s1227_s26 = smov 64  }
 0x322   :  { %598 = vst.msk [vmem:[#allocation4] sm:$0xff] %vm160_vm0, %v1201_v33  ;;  %v606_v2 = vstv %s605_s18  ;;  %v650_v26 = vld [vmem:[%s1704_s12 + $0x48] sm:$0xff]  ;;  %v649_v27 = vld [vmem:[%s1704_s12 + $0x40] sm:$0xff]  ;;  %v648_v29 = vld [vmem:[%s1704_s12 + $0x38] sm:$0xff]  ;;  %s699_s21 = sshll.u32 %s1706_s14, 4  ;;  %s700_s21 = int_to_ptr.hbm [resolvable:$true] %s699_s21 }
 0x323   :  { %599 = vst.msk [vmem:[#allocation5] sm:$0xff] %vm160_vm0, %v1197_v32  ;;  %935 = vrcp.f32 %v606_v2  ;;  %v618_v5 = vand.u32 2147483648, %v606_v2  ;;  %vm612_vm3 = vweird.f32 %v606_v2  ;;  %v616_v7 = vand.u32 2147483647, %v606_v2  ;;  %662 = vmatpush.msra.mxu0 %v655_v16  ;;  %v646_v34 = vld [vmem:[%s1704_s12 + $0x28] sm:$0xff]  ;;  %v645_v37 = vld [vmem:[%s1704_s12 + $0x20] sm:$0xff] }
 0x324   :  { %600 = vst.msk [vmem:[#allocation6] sm:$0xff] %vm160_vm0, %v1193_v31  ;;  %v644_v38 = vld [vmem:[%s1704_s12 + $0x18] sm:$0xff]  ;;  %v643_v39 = vld [vmem:[%s1704_s12 + $0x10] sm:$0xff]  ;;  %v934_v47 = vld [vmem:[%s1705_s13] ss:$0 sm:$0xff] }
 0x325   :  { %601 = vst.msk [vmem:[#allocation7] sm:$0xff] %vm160_vm0, %v1189_v30  ;;  %v619_v9 = vor.u32 1.1754944e-38, %v618_v5  ;;  %vm617_vm6 = vcmp.eq.f32.partialorder %v616_v7, 8.507059e+37  ;;  %663 = vmatpush.msra.mxu0 %v654_v17  ;;  %v647_v30 = vld [vmem:[%s1704_s12 + $0x30] sm:$0xff] }
 0x327   :  { %664 = vmatpush.msra.mxu0 %v653_v20 }
 0x329   :  { %v936_v3 = vpop.eup %935  ;;  %665 = vmatpush.msra.mxu0 %v652_v21 }
 0x32a   :  { %v608_v4 = vmul.f32 %v936_v3, %v606_v2  ;;  %vm613_vm4 = vweird.f32 %v936_v3 }
 0x32b   :  { %vm614_vm5 = vmor %vm612_vm3, %vm613_vm4  ;;  %666 = vmatpush.msra.mxu0 %v651_v28 }
 0x32c   :  { %v609_v6 = vsub.f32 1.0, %v608_v4 }
 0x32d   :  { %667 = vmatpush.msra.mxu0 %v650_v26 }
 0x32e   :  { %v610_v8 = vmul.f32 %v936_v3, %v609_v6 }
 0x32f   :  { %668 = vmatpush.msra.mxu0 %v649_v27 }
 0x330   :  { %v611_v10 = vadd.f32 %v936_v3, %v610_v8 }
 0x331   :  { %669 = vmatpush.msra.mxu0 %v648_v29 }
 0x332   :  { %v615_v11 = vsel %vm614_vm5, %v936_v3, %v611_v10 }
 0x333   :  { %v620_v12 = vsel %vm617_vm6, %v619_v9, %v615_v11  ;;  %670 = vmatpush.msra.mxu0 %v647_v30 }
 0x334   :  { %793 = vpush %v620_v12 }
 0x335   :  { %671 = vmatpush.msra.mxu0 %v646_v34 }
 0x337   :  { %672 = vmatpush.msra.mxu0 %v645_v37 }
 0x339   :  { %673 = vmatpush.msra.mxu0 %v644_v38 }
 0x33b   :  { %674 = vmatpush.msra.mxu0 %v643_v39 }
 0x365   :  { %s794_s25 = spop %793 }
 0x366   :  { %v622_v35 = vstv %s794_s25 }
 0x367   :  { %v624_v36 = vmul.f32 %v1197_v32, %v622_v35  ;;  %v642_v32 = vld [vmem:[%s1704_s12 + $0x8] sm:$0xff]  ;;  %v623_v41 = vmul.f32 %v1201_v33, %v622_v35 }
 0x368   :  { %675 = vmatpush.msra.mxu0 %v642_v32 }
 0x369   :  { %626 = vrot.lane.b32.xlu0 %v624_v36, %s1226_s1 }
 0x371   :  { %630 = vrot.lane.b32.xlu0 %v1193_v31, %s1227_s26  ;;  %v641_v31 = vld [vmem:[%s1704_s12] sm:$0xff]  ;;  %s1228_s12 = smov [#allocation21]  }
 0x372   :  { %676 = vmatpush.msra.mxu0 %v641_v31  ;;  %s697_s7 = sshll.u32 %s1228_s12, 4  ;;  %s698_s7 = int_to_ptr.vmem [resolvable:$true] %s697_s7 }
 0x393   :  { %v635_v42 = vpop.permute.xlu1 %634 }
 0x3db   :  { %v627_v40 = vpop.permute.xlu0 %626 }
 0x3dc   :  { %v637_v43 = vsel %vm160_vm0, %v623_v41, %v627_v40 }
 0x3e3   :  { %v631_v44 = vpop.permute.xlu0 %630 }
 0x3e4   :  { %v639_v45 = vsel %vm638_vm7, %v637_v43, %v631_v44 }
 0x3e5   :  { %v640_v46 = vsel %vm247_vm2, %v639_v45, %v635_v42 }
 0x3e6   :  { %677 = vmatmul.f32.vlgmr.msra.gmra.mxu0 %v640_v46 }
 0x463   :  { %v678_v48 = vpop.f32.mrf.mxu0 }
 0x464   :  { %v679_v49 = vadd.f32 %v934_v47, %v678_v48 }
 0x466   :  { %681 = vmax.xlane.f32.xlu1 %v679_v49 }
 0x4d9   :  { %v682_v50 = vpop.xlane.xlu1 %681 }
 0x4da   :  { %v683_v13 = vsub.f32 %v679_v49, %v682_v50 }
 0x4dc   :  { %v684_v14 = vmul.f32 1.442695, %v683_v13 }
 0x4de   :  { %937 = vpow2.f32 %v684_v14 }
 0x4e4   :  { %v938_v33 = vpop.eup %937 }
 0x4e5   :  { %686 = vadd.xlane.f32.xlu2 %v938_v33 }
 0x558   :  { %v687_v51 = vpop.xlane.xlu2 %686 }
 0x559   :  { %939 = vlog2.f32 %v687_v51 }
 0x55f   :  { %v940_v52 = vpop.eup %939 }
 0x560   :  { %v689_v53 = vmul.f32 0.6931472, %v940_v52 }
 0x562   :  { %v690_v54 = vsub.f32 %v683_v13, %v689_v53 }
 0x564   :  { %691 = vst [vmem:[#allocation21] sm:$0xff] %v690_v54 }
 0x565   :  { %702 = dma.vmem_to_hbm [thread:$0]  %s698_s7, 128, %s700_s21, [#allocation14]  }
 0x566   :  { %1157 = dma.done.wait [#allocation14], 128  }
 0x567   :  { %1158 = vsyncadd [#allocation14], 4294967168 }
 0x568   :  { %707 = vsyncpa [#allocation13], 1 }
 0x569   :  { %708 = vsyncpa [#allocation16], 1 }
 0x56a   :  { %709 = vsyncpa [#allocation19], 1 }
 0x56b   :  { %710 = vsyncpa [#allocation14], 1 }

</bundles_post_ra>
